<compile_context>
chip_gen: v6e
topology: v6e:2x2x1
jax: 0.10.0
libtpu: 0.0.40
codegen_flags: <defaults>
</compile_context>

<pallas_src>
import functools

import jax
import jax.numpy as jnp
from jax.experimental import pallas as pl
from jax.experimental.pallas import tpu as pltpu


LN_EPS = 1e-5  # nn.LayerNorm default


def _round_up(v, m):
    return ((v + m - 1) // m) * m


def _choose_tile_m(m, tile_m_max):
    """Pick a row tile: big (amortize ~0.35us/step), 8-aligned, grid >= 2."""
    n_tiles = max(2, pl.cdiv(m, tile_m_max)) if m >= 16 else 1
    return _round_up(pl.cdiv(m, n_tiles), 8)


def _patch_embed_kernel(p_ref, w_ref, prm_ref, o_ref, *, inv_e):
    # p_ref:   (TM, K)      patch rows (x.dtype)
    # w_ref:   (K, E_pad)   projection weight, transposed + lane-padded
    # prm_ref: (8, E_pad)   f32 params: [0]=bias [1]=gamma [2]=beta [3]=lane mask
    # o_ref:   (TM, E_pad)
    y = jnp.dot(p_ref[...], w_ref[...], preferred_element_type=jnp.float32)

    bias = prm_ref[0:1, :]
    gamma = prm_ref[1:2, :]
    beta = prm_ref[2:3, :]
    mask = prm_ref[3:4, :]   # 1.0 on real embedding lanes, 0.0 on the pad

    # LayerNorm over the true E lanes only (mask keeps padded lanes at 0 and
    # out of the variance); divisor is the true E via inv_e.
    y = (y + bias) * mask
    mean = jnp.sum(y, axis=-1, keepdims=True) * inv_e
    centered = (y - mean) * mask
    var = jnp.sum(centered * centered, axis=-1, keepdims=True) * inv_e
    inv = jax.lax.rsqrt(var + LN_EPS)
    out = centered * inv * gamma + beta          # padded lanes -> exactly 0
    o_ref[...] = out.astype(o_ref.dtype)


def patch_embed_3d(x, weight, bias, gamma, beta, patch_size, *, tile_m_max=512):
    """
    Args:
      x:      (B, C, D, H, W)               float32 or bfloat16
      weight: (E, C, pd, ph, pw)            PyTorch Conv3d weight layout
      bias:   (E,)   Conv3d bias
      gamma:  (E,)   LayerNorm weight
      beta:   (E,)   LayerNorm bias
    Returns:
      (B, N, E) in x.dtype, N = (D//pd)*(H//ph)*(W//pw)
    """
    pd_, ph_, pw_ = patch_size
    B, C, D, H, W = x.shape
    E = weight.shape[0]
    Dp, Hp, Wp = D // pd_, H // ph_, W // pw_
    # Conv3d with stride == kernel simply drops any remainder; match that.
    x = x[:, :, :Dp * pd_, :Hp * ph_, :Wp * pw_]
    N = Dp * Hp * Wp
    K = C * pd_ * ph_ * pw_
    M = B * N

    # ---- host-side glue (plain JAX): im2col rows + dense weight/params ----
    # rows ordered (b, d', h', w'), cols ordered (c, kd, kh, kw): matches
    # PyTorch's flatten(2).transpose(1,2) and Conv3d weight flattening.
    patches = x.reshape(B, C, Dp, pd_, Hp, ph_, Wp, pw_)
    patches = patches.transpose(0, 2, 4, 6, 1, 3, 5, 7).reshape(M, K)

    # Lane-dense E: pad embedding dim to a multiple of 128 (unmasked stores),
    # slice back outside.  K is NOT padded (would double HBM bytes).
    E_pad = _round_up(E, 128)
    w2d = weight.reshape(E, K).T.astype(x.dtype)          # (K, E)
    if E_pad != E:
        w2d = jnp.pad(w2d, ((0, 0), (0, E_pad - E)))

    prm = jnp.zeros((8, E_pad), jnp.float32)
    prm = prm.at[0, :E].set(bias.astype(jnp.float32))
    prm = prm.at[1, :E].set(gamma.astype(jnp.float32))
    prm = prm.at[2, :E].set(beta.astype(jnp.float32))
    prm = prm.at[3, :E].set(1.0)                           # lane mask

    tile_m = _choose_tile_m(M, tile_m_max)
    M_pad = _round_up(M, tile_m)
    if M_pad != M:
        patches = jnp.pad(patches, ((0, M_pad - M), (0, 0)))

    grid = (M_pad // tile_m,)
    kernel = functools.partial(_patch_embed_kernel, inv_e=1.0 / E)

    # NOTE: the weight / param blocks are grid-invariant; pl.Buffered(1) would
    # drop their second pipeline buffer, but at <100 KiB total the default
    # double-buffering is harmless, so we keep it for lowering robustness.
    out = pl.pallas_call(
        kernel,
        out_shape=jax.ShapeDtypeStruct((M_pad, E_pad), x.dtype),
        grid_spec=pltpu.PrefetchScalarGridSpec(
            num_scalar_prefetch=0,
            grid=grid,
            in_specs=[
                pl.BlockSpec((tile_m, K), lambda i: (i, 0)),     # streamed
                pl.BlockSpec((K, E_pad), lambda i: (0, 0)),      # invariant
                pl.BlockSpec((8, E_pad), lambda i: (0, 0)),      # invariant
            ],
            out_specs=pl.BlockSpec((tile_m, E_pad), lambda i: (i, 0)),
        ),
        compiler_params=pltpu.CompilerParams(
            dimension_semantics=("parallel",),
        ),
    )(patches, w2d, prm)

    return out[:M, :E].reshape(B, N, E)


def _reference(x, weight, bias, gamma, beta, patch_size):
    """Pure-JAX reference matching PyTorch PatchEmbed3D.forward (f32)."""
    pd_, ph_, pw_ = patch_size
    y = jax.lax.conv_general_dilated(
        x, weight,
        window_strides=(pd_, ph_, pw_),
        padding="VALID",
        dimension_numbers=("NCDHW", "OIDHW", "NCDHW"),
    ) + bias.reshape(1, -1, 1, 1, 1)
    B, E = y.shape[0], y.shape[1]
    y = y.reshape(B, E, -1).transpose(0, 2, 1)             # (B, N, E)
    mean = jnp.mean(y, axis=-1, keepdims=True)
    var = jnp.mean((y - mean) ** 2, axis=-1, keepdims=True)
    yn = (y - mean) / jnp.sqrt(var + LN_EPS)
    return yn * gamma + beta


if __name__ == "__main__":
    patch_size = (4, 4, 4)
    in_channels = 1
    embed_dim = 96            # module default -> exercises the E->128 lane pad
    B, D, H, W = 2, 16, 16, 16

    key = jax.random.PRNGKey(0)
    kx, kw, kb, kg, kbe = jax.random.split(key, 5)
    x = jax.random.normal(kx, (B, in_channels, D, H, W), dtype=jnp.float32)
    weight = 0.02 * jax.random.normal(
        kw, (embed_dim, in_channels) + patch_size, dtype=jnp.float32)
    bias = 0.01 * jax.random.normal(kb, (embed_dim,), dtype=jnp.float32)
    gamma = 1.0 + 0.05 * jax.random.normal(kg, (embed_dim,), dtype=jnp.float32)
    beta = 0.05 * jax.random.normal(kbe, (embed_dim,), dtype=jnp.float32)

    fn = jax.jit(functools.partial(patch_embed_3d, patch_size=patch_size))

    # f32 end-to-end: tight check against the conv+LN reference.
    out = jax.block_until_ready(fn(x, weight, bias, gamma, beta))
    N = (D // 4) * (H // 4) * (W // 4)
    assert out.shape == (B, N, embed_dim), out.shape
    ref = _reference(x, weight, bias, gamma, beta, patch_size)
    err = float(jnp.max(jnp.abs(out - ref)))
    assert err < 2e-4, f"f32 max abs err {err}"

    # bf16 streaming path (halves HBM bytes of the dominant stream; f32
    # accumulation + f32 LayerNorm inside the kernel, bf16 output).
    out_bf16 = jax.block_until_ready(
        fn(x.astype(jnp.bfloat16), weight.astype(jnp.bfloat16),
           bias, gamma, beta))
    assert out_bf16.shape == (B, N, embed_dim)
    assert out_bf16.dtype == jnp.bfloat16
    err_bf16 = float(jnp.max(jnp.abs(out_bf16.astype(jnp.float32) - ref)))
    assert err_bf16 < 6e-2, f"bf16 max abs err {err_bf16}"

    print("KERNEL_OK")
</pallas_src>

<mosaic_0001>
module attributes {stable_mosaic.version = 11 : i64} {
  func.func @_patch_embed_kernel(%arg0: i32, %arg1: memref<64x64xf32, #tpu.memory_space<vmem>>, %arg2: memref<64x128xf32, #tpu.memory_space<vmem>>, %arg3: memref<8x128xf32, #tpu.memory_space<vmem>>, %arg4: memref<64x128xf32, #tpu.memory_space<vmem>>) attributes {dimension_semantics = [#tpu.dimension_semantics<parallel>], iteration_bounds = array<i64: 2>, scalar_prefetch = 0 : i64, scratch_operands = 0 : i64, tpu.core_type = #tpu.core_type<tc>, window_params = [{transform_indices = @transform_0, window_bounds = array<i64: 64, 64>}, {pipeline_mode = #tpu.pipeline_mode<synchronous>, transform_indices = @transform_1, window_bounds = array<i64: 64, 128>}, {pipeline_mode = #tpu.pipeline_mode<synchronous>, transform_indices = @transform_2, window_bounds = array<i64: 8, 128>}, {transform_indices = @transform_3, window_bounds = array<i64: 64, 128>}]} {
    %c0 = arith.constant 0 : index
    %c0_0 = arith.constant 0 : index
    %0 = vector.load %arg1[%c0, %c0_0] : memref<64x64xf32, #tpu.memory_space<vmem>>, vector<64x64xf32>
    %c0_1 = arith.constant 0 : index
    %c0_2 = arith.constant 0 : index
    %1 = vector.load %arg2[%c0_1, %c0_2] : memref<64x128xf32, #tpu.memory_space<vmem>>, vector<64x128xf32>
    %cst = arith.constant dense<0.000000e+00> : vector<64x128xf32>
    %2 = tpu.matmul %0, %1, %cst {dimension_numbers = #tpu.dot_dimension_numbers<[1], [0], [0], [1], [0, 0, 1, 1], [], []>} : vector<64x64xf32>, vector<64x128xf32>, vector<64x128xf32> -> vector<64x128xf32>
    %c0_3 = arith.constant 0 : index
    %c0_4 = arith.constant 0 : index
    %3 = vector.load %arg3[%c0_3, %c0_4] : memref<8x128xf32, #tpu.memory_space<vmem>>, vector<1x128xf32>
    %c1 = arith.constant 1 : index
    %c0_5 = arith.constant 0 : index
    %4 = vector.load %arg3[%c1, %c0_5] : memref<8x128xf32, #tpu.memory_space<vmem>>, vector<1x128xf32>
    %c2 = arith.constant 2 : index
    %c0_6 = arith.constant 0 : index
    %5 = vector.load %arg3[%c2, %c0_6] : memref<8x128xf32, #tpu.memory_space<vmem>>, vector<1x128xf32>
    %c3 = arith.constant 3 : index
    %c0_7 = arith.constant 0 : index
    %6 = vector.load %arg3[%c3, %c0_7] : memref<8x128xf32, #tpu.memory_space<vmem>>, vector<1x128xf32>
    %7 = vector.broadcast %3 : vector<1x128xf32> to vector<64x128xf32>
    %8 = arith.addf %2, %7 : vector<64x128xf32>
    %9 = vector.broadcast %6 : vector<1x128xf32> to vector<64x128xf32>
    %10 = arith.mulf %8, %9 : vector<64x128xf32>
    %cst_8 = arith.constant dense<0.000000e+00> : vector<64xf32>
    %11 = vector.multi_reduction <add>, %10, %cst_8 [1] : vector<64x128xf32> to vector<64xf32>
    %12 = vector.shape_cast %11 : vector<64xf32> to vector<64x1xf32>
    %cst_9 = arith.constant 0.010416667 : f32
    %13 = vector.broadcast %cst_9 : f32 to vector<64x1xf32>
    %14 = arith.mulf %12, %13 : vector<64x1xf32>
    %15 = vector.broadcast %14 : vector<64x1xf32> to vector<64x128xf32>
    %16 = arith.subf %10, %15 : vector<64x128xf32>
    %17 = vector.broadcast %6 : vector<1x128xf32> to vector<64x128xf32>
    %18 = arith.mulf %16, %17 : vector<64x128xf32>
    %19 = arith.mulf %18, %18 : vector<64x128xf32>
    %cst_10 = arith.constant dense<0.000000e+00> : vector<64xf32>
    %20 = vector.multi_reduction <add>, %19, %cst_10 [1] : vector<64x128xf32> to vector<64xf32>
    %21 = vector.shape_cast %20 : vector<64xf32> to vector<64x1xf32>
    %cst_11 = arith.constant 0.010416667 : f32
    %22 = vector.broadcast %cst_11 : f32 to vector<64x1xf32>
    %23 = arith.mulf %21, %22 : vector<64x1xf32>
    %cst_12 = arith.constant 9.99999974E-6 : f32
    %24 = vector.broadcast %cst_12 : f32 to vector<64x1xf32>
    %25 = arith.addf %23, %24 : vector<64x1xf32>
    %26 = math.rsqrt %25 : vector<64x1xf32>
    %27 = vector.broadcast %26 : vector<64x1xf32> to vector<64x128xf32>
    %28 = arith.mulf %18, %27 : vector<64x128xf32>
    %29 = vector.broadcast %4 : vector<1x128xf32> to vector<64x128xf32>
    %30 = arith.mulf %28, %29 : vector<64x128xf32>
    %31 = vector.broadcast %5 : vector<1x128xf32> to vector<64x128xf32>
    %32 = arith.addf %30, %31 : vector<64x128xf32>
    %c0_13 = arith.constant 0 : index
    %c0_14 = arith.constant 0 : index
    %33 = vector.load %arg4[%c0_13, %c0_14] : memref<64x128xf32, #tpu.memory_space<vmem>>, vector<64x128xf32>
    tpu.vector_store %arg4[%c0_13, %c0_14], %32 {strides = array<i32>} : memref<64x128xf32, #tpu.memory_space<vmem>>, vector<64x128xf32>,
    return
  }
  func.func @transform_0(%arg0: i32) -> (i32, i32) {
    %c0_i32 = arith.constant 0 : i32
    %c0_i32_0 = arith.constant 0 : i32
    return %arg0, %c0_i32 : i32, i32
  }
  func.func @transform_1(%arg0: i32) -> (i32, i32) {
    %c0_i32 = arith.constant 0 : i32
    %c0_i32_0 = arith.constant 0 : i32
    %c0_i32_1 = arith.constant 0 : i32
    return %c0_i32, %c0_i32_0 : i32, i32
  }
  func.func @transform_2(%arg0: i32) -> (i32, i32) {
    %c0_i32 = arith.constant 0 : i32
    %c0_i32_0 = arith.constant 0 : i32
    %c0_i32_1 = arith.constant 0 : i32
    return %c0_i32, %c0_i32_0 : i32, i32
  }
  func.func @transform_3(%arg0: i32) -> (i32, i32) {
    %c0_i32 = arith.constant 0 : i32
    %c0_i32_0 = arith.constant 0 : i32
    return %arg0, %c0_i32 : i32, i32
  }
}

</mosaic_0001>

<bundles_post_ra>
// kernel: patch_embed_3d.1
= control target key start
LH: loop header
LB: loop body
LE: loop exit
PB: predicated region body
PF: predicated region fallthrough
CT: control target
= control target key end

     0   :  { %8 = vsyncpa [#allocation3], 0  ;;  %s987_s0 = inlined_call_operand.vmem [shape: f32[128,64], index: 0, kind: input, shape index: {}]   ;;  %s988_s1 = inlined_call_operand.vmem [shape: f32[64,128], index: 1, kind: input, shape index: {}]   ;;  %s989_s2 = inlined_call_operand.vmem [shape: f32[8,128], index: 2, kind: input, shape index: {}]   ;;  %s990_s3 = inlined_call_operand.hbm [shape: f32[128,128], index: 3, kind: output, shape index: {}]  }
   0x1   :  { %10 = vsyncpa [#allocation3 + $0x1], 0  ;;  %s769_s12 = smov 0   ;;  %s771_s13 = smov 0  }
   0x2   :  { %s773_s14 = smov 0   ;;  %s775_s15 = smov 0  }
   0x3 LB: > { %s790_s16 = sadd.s32 4294967295, %s744_s15   ;;  %s542_s17 = sadd.s32 4294967294, %s744_s15   ;;  %s744_s15 = sphi %s775_s15, %s996_s15   ;;  %s740_s14 = sphi %s773_s14, %s995_s14   ;;  %s736_s13 = sphi %s771_s13, %s994_s13   ;;  %s732_s12 = sphi %s769_s12, %s993_s12  }
   0x4   : > { %s794_s18 = sadd.s32 1, %s744_s15   ;;  %s91_s19 = sadd.s32 1, %s740_s14 }
   0x5   : > { %s88_s20 = ssub.s32 %s744_s15, %s794_s18  ;;  %p101_p0 = scmp.ne.s32.totalorder %s740_s14, %s736_s13 }
   0x6   : > { %p89_p1 = scmp.eq.s32.totalorder %s88_s20, 0  ;;  %p102_p2 = scmp.eq.s32.totalorder %s790_s16, 1 }
   0x7   : > { %p107_p3 = scmp.ne.s32.totalorder %s736_s13, %s732_s12  ;;  %p108_p4 = scmp.eq.s32.totalorder %s542_s17, 1 }
   0x8   : > { %s805_s21 = scalar_select %p89_p1, %s740_s14, %s91_s19  }
   0x9   : > { %p807_p5 = por %p102_p2, %p101_p0  ;;  %p811_p6 = por %p108_p4, %p107_p3 }
   0xa   : > { %p545_p7 = scmp.ge.s32.totalorder %s744_s15, 1  ;;  %p141_p8 = scmp.lt.s32.totalorder %s744_s15, 3 }
   0xc   : > { %p142_p9 = pnand %p545_p7, %p141_p8 }
   0xd   : > { %s547_s28 = sshll.u32 (!%p142_p9), %s790_s16, 3  ;;  %s162_s4 = sand.u32 (!%p142_p9), 1, %s736_s13  }
   0xe   : > { %145 = sbr.rel (%p142_p9) target bundleno = 572 (0x23c), region = 32  ;;  %p166_p10 = scmp.lt.s32.totalorder (!%p142_p9), %s547_s28, 15 }
   0xf   : > { %s546_s7 = sshll.u32 (!%p142_p9), %s162_s4, 6  ;;  %s566_s11 = sshll.u32 (!%p142_p9), %s790_s16, 10 }
  0x10   : > { %s947_s25 = scalar_lea.sflag (!%p142_p9), [#allocation3], %s162_s4  ;;  %s746_s26 = smov (!%p142_p9), [#allocation2]  }
  0x11   : > { %s688_s27 = sshll.u32 (!%p142_p9), %s746_s26, 4  ;;  %s689_s27 = int_to_ptr.vmem [resolvable:$false] %s688_s27 }
  0x13   : > { %v187_v0 = vld [vmem:[%s988_s1 + $0x38] sm:$0xff]  ;;  %v186_v1 = vld [vmem:[%s988_s1 + $0x30] sm:$0xff]  ;;  %v185_v2 = vld [vmem:[%s988_s1 + $0x28] sm:$0xff]  ;;  %s998_s28 = smov (!%p166_p10, %s547_s28), 15  ;;  %vm196_vm0 = vcmask 523264  }
  0x14   : > { %583 = vmatprep.subr.mxu0 %v187_v0  ;;  %611 = vmatprep.subr.mxu1 %v187_v0  ;;  %v184_v3 = vld [vmem:[%s988_s1 + $0x20] sm:$0xff]  ;;  %v183_v4 = vld [vmem:[%s988_s1 + $0x18] sm:$0xff]  ;;  %v182_v5 = vld [vmem:[%s988_s1 + $0x10] sm:$0xff]  ;;  %s548_s10 = sshll.u32 %s998_s28, 3  ;;  %s690_s28 = scalar_lea.vmem %s689_s27, 2048 }
  0x15   : > { %584 = vmatpush3.msra.mxu0 %v187_v0  ;;  %619 = vmatpush3.msra.mxu1 %v187_v0  ;;  %v181_v6 = vld [vmem:[%s988_s1 + $0x8] sm:$0xff]  ;;  %s169_s24 = scalar_lea.vmem %s987_s0, %s548_s10  ;;  %v180_v7 = vld [vmem:[%s988_s1] sm:$0xff]  ;;  %s921_s10 = scalar_lea.vmem [#allocation2], %s546_s7 }
  0x16   : > { %585 = vmatprep.subr.mxu0 %v186_v1  ;;  %612 = vmatprep.subr.mxu1 %v186_v1  ;;  %v172_v8 = vld [vmem:[%s169_s24] sm:$0xff]  ;;  %v173_v10 = vld [vmem:[%s169_s24 + $0x8] sm:$0xff]  ;;  %v174_v12 = vld [vmem:[%s169_s24 + $0x10] sm:$0xff]  ;;  %s480_s17 = sshll.u32 %s921_s10, 4  ;;  %s942_s17 = int_to_ptr.vmem [resolvable:$true] %s480_s17 }
  0x17   : > { %586 = vmatpush3.msra.mxu0 %v186_v1  ;;  %620 = vmatpush3.msra.mxu1 %v186_v1  ;;  %v176_v9 = vld [vmem:[%s169_s24 + $0x20] sm:$0xff]  ;;  %v177_v11 = vld [vmem:[%s169_s24 + $0x28] sm:$0xff]  ;;  %v178_v13 = vld [vmem:[%s169_s24 + $0x30] sm:$0xff]  ;;  %s684_s16 = scalar_lea.vmem %s942_s17, 1024  ;;  %p691_p0 = scmp.lt.s32.totalorder %s942_s17, %s689_s27 }
  0x18   : > { %587 = vmatprep.subr.mxu0 %v185_v2  ;;  %613 = vmatprep.subr.mxu1 %v185_v2  ;;  %v175_v14 = vld [vmem:[%s169_s24 + $0x18] sm:$0xff]  ;;  %v549_v16 = vld [vmem:[%s989_s2] ss:$0 sm:$0xff]  ;;  %v859_v19 = vld [vmem:[%s989_s2 + $0x3] ss:$0 sm:$0xff]  ;;  %p685_p11 = scmp.ne.s32.totalorder %s942_s17, %s684_s16  ;;  %p692_p1 = scmp.lt.s32.totalorder %s690_s28, %s684_s16 }
  0x19   : > { %588 = vmatpush3.msra.mxu0 %v185_v2  ;;  %621 = vmatpush3.msra.mxu1 %v185_v2  ;;  %v179_v15 = vld [vmem:[%s169_s24 + $0x38] sm:$0xff]  ;;  %s940_s24 = scalar_lea.hbm %s990_s3, %s566_s11 }
  0x1a   : > { %589 = vmatprep.subr.mxu0 %v184_v3  ;;  %614 = vmatprep.subr.mxu1 %v184_v3  ;;  %p686_p12 = pnand %p685_p11, %p807_p5  ;;  %p693_p2 = por %p692_p1, %p691_p0 }
  0x1b   : > { %590 = vmatpush3.msra.mxu0 %v184_v3  ;;  %622 = vmatpush3.msra.mxu1 %v184_v3 }
  0x1c   : > { %591 = vmatprep.subr.mxu0 %v183_v4  ;;  %615 = vmatprep.subr.mxu1 %v183_v4  ;;  %p687_p13 = pneg %p686_p12 }
  0x1d   : > { %592 = vmatpush3.msra.mxu0 %v183_v4  ;;  %623 = vmatpush3.msra.mxu1 %v183_v4 }
  0x1e   : > { %593 = vmatprep.subr.mxu0 %v182_v5  ;;  %616 = vmatprep.subr.mxu1 %v182_v5  ;;  %p694_p3 = pnand %p693_p2, %p687_p13 }
  0x1f   : > { %594 = vmatpush3.msra.mxu0 %v182_v5  ;;  %624 = vmatpush3.msra.mxu1 %v182_v5 }
  0x20   : > { %595 = vmatprep.subr.mxu0 %v181_v6  ;;  %617 = vmatprep.subr.mxu1 %v181_v6 }
  0x21   : > { %596 = vmatpush3.msra.mxu0 %v181_v6  ;;  %625 = vmatpush3.msra.mxu1 %v181_v6 }
  0x22   : > { %597 = vmatprep.subr.mxu0 %v180_v7  ;;  %618 = vmatprep.subr.mxu1 %v180_v7 }
  0x23   : > { %598 = vmatpush3.msra.mxu0 %v180_v7  ;;  %626 = vmatpush3.msra.mxu1 %v180_v7 }
  0x24   : > { %599 = vmatprep.mubr.msk.f32.mxu0 %vm196_vm0, %v172_v8  ;;  %605 = vmatprep.mubr.msk.f32.mxu1 %vm196_vm0, %v176_v9 }
  0x25   : > { %600 = vmatmul.mubr.msk.f32.vlgmr.msra.gmra.mxu0 %vm196_vm0, %v173_v10  ;;  %606 = vmatmul.mubr.msk.f32.vlgmr.msra.gmra.mxu1 %vm196_vm0, %v177_v11 }
  0x26   : > { %602 = vmatprep.mubr.msk.f32.mxu0 %vm196_vm0, %v174_v12  ;;  %608 = vmatprep.mubr.msk.f32.mxu1 %vm196_vm0, %v178_v13 }
  0x29   : > { %603 = vmatmul.mubr.msk.f32.gmra.mxu0 %vm196_vm0, %v175_v14  ;;  %609 = vmatmul.mubr.msk.f32.gmra.mxu1 %vm196_vm0, %v179_v15 }
  0xe5   : > { %v601_v17 = vpop.f32.mrf.mxu0  ;;  %v607_v18 = vpop.f32.mrf.mxu1 }
  0xe6   : > { %v293_v20 = vadd.f32 %v601_v17, %v549_v16  ;;  %v313_v21 = vadd.f32 %v607_v18, %v549_v16 }
  0xe7   : > { %v287_v22 = vpop.f32.mrf.mxu0  ;;  %v307_v23 = vpop.f32.mrf.mxu1 }
  0xe8   : > { %v288_v24 = vadd.f32 %v549_v16, %v287_v22  ;;  %v335_v25 = vmul.f32 %v859_v19, %v313_v21  ;;  %v331_v26 = vmul.f32 %v859_v19, %v293_v20  ;;  %v308_v32 = vadd.f32 %v549_v16, %v307_v23 }
  0xe9   : > { %v604_v27 = vpop.f32.mrf.mxu0  ;;  %v610_v28 = vpop.f32.mrf.mxu1 }
  0xea   : > { %v303_v29 = vadd.f32 %v604_v27, %v549_v16  ;;  %348 = vadd.xlane.f32.xlu1 %v335_v25  ;;  %340 = vadd.xlane.f32.xlu0 %v331_v26  ;;  %v330_v35 = vmul.f32 %v859_v19, %v288_v24  ;;  %v323_v36 = vadd.f32 %v610_v28, %v549_v16 }
  0xeb   : > { %v297_v30 = vpop.f32.mrf.mxu0  ;;  %v317_v31 = vpop.f32.mrf.mxu1  ;;  %v334_v39 = vmul.f32 %v859_v19, %v308_v32 }
  0xec   : > { %v298_v33 = vadd.f32 %v549_v16, %v297_v30  ;;  %v333_v34 = vmul.f32 %v859_v19, %v303_v29  ;;  %v318_v37 = vadd.f32 %v549_v16, %v317_v31  ;;  %v337_v40 = vmul.f32 %v859_v19, %v323_v36 }
  0xee   : > { %344 = vadd.xlane.f32.xlu1 %v333_v34  ;;  %338 = vadd.xlane.f32.xlu0 %v330_v35  ;;  %v332_v38 = vmul.f32 %v859_v19, %v298_v33  ;;  %v336_v41 = vmul.f32 %v859_v19, %v318_v37 }
  0xf2   : > { %342 = vadd.xlane.f32.xlu1 %v332_v38  ;;  %346 = vadd.xlane.f32.xlu0 %v334_v39 }
  0xf6   : > { %352 = vadd.xlane.f32.xlu1 %v337_v40  ;;  %350 = vadd.xlane.f32.xlu0 %v336_v41 }
 0x173   : > { %v349_v42 = vpop.xlane.xlu1 %348  ;;  %v341_v43 = vpop.xlane.xlu0 %340 }
 0x174   : > { %v359_v44 = vmul.f32 0.010416667, %v349_v42  ;;  %v355_v45 = vmul.f32 0.010416667, %v341_v43  ;;  %v559_v42 = vld [vmem:[%s989_s2 + $0x1] ss:$0 sm:$0xff] }
 0x176   : > { %v367_v46 = vsub.f32 %v335_v25, %v359_v44  ;;  %v363_v47 = vsub.f32 %v331_v26, %v355_v45  ;;  %v560_v45 = vld [vmem:[%s989_s2 + $0x2] ss:$0 sm:$0xff] }
 0x177   : > { %v345_v48 = vpop.xlane.xlu1 %344  ;;  %v339_v49 = vpop.xlane.xlu0 %338 }
 0x178   : > { %v357_v50 = vmul.f32 0.010416667, %v345_v48  ;;  %v354_v51 = vmul.f32 0.010416667, %v339_v49  ;;  %v870_v52 = vmul.f32 %v859_v19, %v363_v47  ;;  %v875_v56 = vmul.f32 %v859_v19, %v367_v46 }
 0x17a   : > { %v365_v53 = vsub.f32 %v333_v34, %v357_v50  ;;  %v362_v54 = vsub.f32 %v330_v35, %v354_v51  ;;  %v379_v55 = vmul.f32 %v870_v52, %v870_v52  ;;  %v383_v1 = vmul.f32 %v875_v56, %v875_v56 }
 0x17b   : > { %v343_v57 = vpop.xlane.xlu1 %342  ;;  %v347_v58 = vpop.xlane.xlu0 %346 }
 0x17c   : > { %v356_v59 = vmul.f32 0.010416667, %v343_v57  ;;  %v358_v60 = vmul.f32 0.010416667, %v347_v58  ;;  %388 = vadd.xlane.f32.xlu1 %v379_v55  ;;  %v878_v61 = vmul.f32 %v859_v19, %v362_v54  ;;  %v881_v62 = vmul.f32 %v859_v19, %v365_v53 }
 0x17e   : > { %v364_v63 = vsub.f32 %v332_v38, %v356_v59  ;;  %v366_v0 = vsub.f32 %v334_v39, %v358_v60  ;;  %v378_v2 = vmul.f32 %v878_v61, %v878_v61  ;;  %v381_v8 = vmul.f32 %v881_v62, %v881_v62 }
 0x17f   : > { %v353_v3 = vpop.xlane.xlu1 %352  ;;  %v351_v4 = vpop.xlane.xlu0 %350 }
 0x180   : > { %v361_v5 = vmul.f32 0.010416667, %v353_v3  ;;  %v360_v6 = vmul.f32 0.010416667, %v351_v4  ;;  %396 = vadd.xlane.f32.xlu1 %v383_v1  ;;  %386 = vadd.xlane.f32.xlu0 %v378_v2  ;;  %v888_v7 = vmul.f32 %v859_v19, %v366_v0  ;;  %v895_v12 = vmul.f32 %v859_v19, %v364_v63 }
 0x182   : > { %v369_v9 = vsub.f32 %v337_v40, %v361_v5  ;;  %v368_v10 = vsub.f32 %v336_v41, %v360_v6  ;;  %v382_v11 = vmul.f32 %v888_v7, %v888_v7  ;;  %v380_v15 = vmul.f32 %v895_v12, %v895_v12 }
 0x184   : > { %392 = vadd.xlane.f32.xlu1 %v381_v8  ;;  %394 = vadd.xlane.f32.xlu0 %v382_v11  ;;  %v898_v13 = vmul.f32 %v859_v19, %v369_v9  ;;  %v905_v16 = vmul.f32 %v859_v19, %v368_v10 }
 0x186   : > { %v385_v14 = vmul.f32 %v898_v13, %v898_v13  ;;  %v384_v17 = vmul.f32 %v905_v16, %v905_v16 }
 0x188   : > { %400 = vadd.xlane.f32.xlu1 %v385_v14  ;;  %390 = vadd.xlane.f32.xlu0 %v380_v15 }
 0x18c   : > { %398 = vadd.xlane.f32.xlu0 %v384_v17 }
 0x205   : > { %v389_v18 = vpop.xlane.xlu1 %388 }
 0x206   : > { %v403_v20 = vmul.f32 0.010416667, %v389_v18 }
 0x208   : > { %v411_v21 = vadd.f32 1e-05, %v403_v20 }
 0x209   : > { %v397_v22 = vpop.xlane.xlu1 %396  ;;  %v387_v23 = vpop.xlane.xlu0 %386 }
 0x20a   : > { %668 = vrsqrt.f32 %v411_v21  ;;  %v407_v24 = vmul.f32 0.010416667, %v397_v22  ;;  %v402_v25 = vmul.f32 0.010416667, %v387_v23 }
 0x20c   : > { %v415_v26 = vadd.f32 1e-05, %v407_v24  ;;  %v410_v27 = vadd.f32 1e-05, %v402_v25 }
 0x20d   : > { %v393_v28 = vpop.xlane.xlu1 %392  ;;  %v395_v19 = vpop.xlane.xlu0 %394 }
 0x20e   : > { %670 = vrsqrt.f32 %v415_v26  ;;  %v405_v29 = vmul.f32 0.010416667, %v393_v28  ;;  %v406_v30 = vmul.f32 0.010416667, %v395_v19 }
 0x20f   : > { %672 = vrsqrt.f32 %v410_v27 }
 0x210   : > { %v413_v31 = vadd.f32 1e-05, %v405_v29  ;;  %v414_v32 = vadd.f32 1e-05, %v406_v30 }
 0x211   : > { %v401_v33 = vpop.xlane.xlu1 %400  ;;  %v391_v34 = vpop.xlane.xlu0 %390 }
 0x212   : > { %674 = vrsqrt.f32 %v413_v31  ;;  %v409_v35 = vmul.f32 0.010416667, %v401_v33  ;;  %v404_v36 = vmul.f32 0.010416667, %v391_v34 }
 0x213   : > { %676 = vrsqrt.f32 %v414_v32 }
 0x214   : > { %v417_v37 = vadd.f32 1e-05, %v409_v35  ;;  %v412_v38 = vadd.f32 1e-05, %v404_v36 }
 0x215   : > { %v399_v39 = vpop.xlane.xlu0 %398 }
 0x216   : > { %678 = vrsqrt.f32 %v417_v37  ;;  %v408_v40 = vmul.f32 0.010416667, %v399_v39 }
 0x217   : > { %v669_v41 = vpop.eup %668  ;;  %680 = vrsqrt.f32 %v412_v38 }
 0x218   : > { %v427_v43 = vmul.f32 %v669_v41, %v870_v52  ;;  %v416_v44 = vadd.f32 1e-05, %v408_v40 }
 0x21a   : > { %v439_v46 = vmul.f32 %v559_v42, %v427_v43  ;;  %682 = vrsqrt.f32 %v416_v44 }
 0x21b   : > { %v671_v47 = vpop.eup %670 }
 0x21c   : > { %v673_v48 = vpop.eup %672  ;;  %v451_v49 = vadd.f32 %v560_v45, %v439_v46  ;;  %v431_v50 = vmul.f32 %v671_v47, %v875_v56 }
 0x21d   : > { %v426_v51 = vmul.f32 %v673_v48, %v878_v61 }
 0x21e   : > { %459 = vst [vmem:[%s921_s10 + $0x8] sm:$0xff] %v451_v49  ;;  %v443_v52 = vmul.f32 %v559_v42, %v431_v50 }
 0x21f   : > { %v675_v53 = vpop.eup %674  ;;  %v438_v54 = vmul.f32 %v559_v42, %v426_v51 }
 0x220   : > { %v677_v55 = vpop.eup %676  ;;  %v455_v57 = vadd.f32 %v560_v45, %v443_v52  ;;  %v429_v58 = vmul.f32 %v675_v53, %v881_v62 }
 0x221   : > { %v450_v59 = vadd.f32 %v560_v45, %v438_v54  ;;  %v430_v56 = vmul.f32 %v677_v55, %v888_v7 }
 0x222   : > { %463 = vst [vmem:[%s921_s10 + $0x28] sm:$0xff] %v455_v57  ;;  %v441_v60 = vmul.f32 %v559_v42, %v429_v58 }
 0x223   : > { %v679_v61 = vpop.eup %678  ;;  %458 = vst [vmem:[%s921_s10] sm:$0xff] %v450_v59  ;;  %v442_v63 = vmul.f32 %v559_v42, %v430_v56 }
 0x224   : > { %v681_v0 = vpop.eup %680  ;;  %v453_v1 = vadd.f32 %v560_v45, %v441_v60  ;;  %v433_v2 = vmul.f32 %v679_v61, %v898_v13 }
 0x225   : > { %v454_v3 = vadd.f32 %v560_v45, %v442_v63  ;;  %v428_v62 = vmul.f32 %v681_v0, %v895_v12 }
 0x226   : > { %461 = vst [vmem:[%s921_s10 + $0x18] sm:$0xff] %v453_v1  ;;  %v445_v4 = vmul.f32 %v559_v42, %v433_v2 }
 0x227   : > { %v683_v5 = vpop.eup %682  ;;  %462 = vst [vmem:[%s921_s10 + $0x20] sm:$0xff] %v454_v3  ;;  %v440_v6 = vmul.f32 %v559_v42, %v428_v62 }
 0x228   : > { %v457_v7 = vadd.f32 %v560_v45, %v445_v4  ;;  %v432_v8 = vmul.f32 %v683_v5, %v905_v16 }
 0x229   : > { %v452_v9 = vadd.f32 %v560_v45, %v440_v6 }
 0x22a   : > { %465 = vst [vmem:[%s921_s10 + $0x38] sm:$0xff] %v457_v7  ;;  %v444_v10 = vmul.f32 %v559_v42, %v432_v8 }
 0x22b   : > { %460 = vst [vmem:[%s921_s10 + $0x10] sm:$0xff] %v452_v9 }
 0x22c   : > { %v456_v11 = vadd.f32 %v560_v45, %v444_v10 }
 0x22e   : > { %464 = vst [vmem:[%s921_s10 + $0x30] sm:$0xff] %v456_v11 }
 0x22f   : > { %697 = shalt.err (!%p694_p3)
}
 0x230   : > { %s698_s29 = scalar_lea.hbm %s940_s24, 1024  ;;  %s702_s5 = scalar_lea.hbm %s990_s3, 2048 }
 0x231   : > { %p699_p4 = scmp.ne.s32.totalorder %s940_s24, %s698_s29  ;;  %p703_p9 = scmp.lt.s32.totalorder %s940_s24, %s990_s3 }
 0x232   : > { %p704_p10 = scmp.lt.s32.totalorder %s702_s5, %s698_s29 }
 0x233   : > { %p700_p7 = pnand %p699_p4, %p807_p5 }
 0x234   : > { %p705_p11 = por %p704_p10, %p703_p9 }
 0x235   : > { %p701_p8 = pneg %p700_p7 }
 0x237   : > { %p706_p12 = pnand %p705_p11, %p701_p8 }
 0x239   : > { %709 = shalt.err (!%p706_p12)
}
 0x23a   : > { %s747_s8 = smov 128   ;;  %s748_s9 = smov 8  }
 0x23b   : > { %627 = dma.vmem_to_hbm [thread:$0]  (%p807_p5), %s942_s17, 1024, %s940_s24, %s947_s25, %s747_s8, %s747_s8, %s748_s9  }
 0x23c PF: > { %p633_p13 = scmp.ge.s32.totalorder %s744_s15, 2  ;;  %s495_s10 = sand.u32 1, %s732_s12  }
 0x23d   : > { %s496_s11 = scalar_lea.sflag [#allocation3], %s495_s10 }
 0x23e   : > { %p630_p0 = pnand %p633_p13, %p811_p6 }
 0x240   : > { %p631_p1 = pneg %p630_p0 }
 0x242   : > { %727 = dma.done.wait (%p631_p1), %s496_s11, 1024  }
 0x243   : > { %729 = vsyncadd (%p631_p1), %s496_s11, 4294966272  ;;  %p13_p2 = scmp.ge.s32.totalorder %s794_s18, 4   ;;  %s993_s12 = smov %s736_s13 }
 0x244   : > { %s994_s13 = smov %s740_s14  ;;  %s995_s14 = smov %s805_s21 }
 0x245   : > { %s996_s15 = smov %s794_s18  ;;  %15 = sbr.rel (!%p13_p2) target bundleno = 3 (0x3), region = 67 }
 0x24a   :  { %501 = vsyncpa [#allocation3], 1 }
 0x24b   :  { %503 = vsyncpa [#allocation3 + $0x1], 1 }

</bundles_post_ra>
